<compile_context>
chip_gen: v7x
topology: tpu7x:2x2x1
jax: 0.10.0
libtpu: 0.0.40
codegen_flags: <defaults>
</compile_context>

<pallas_src>
import jax
import jax.numpy as jnp
from jax import lax
from jax.experimental import pallas as pl
from jax.experimental.pallas import tpu as pltpu

_MAX_TB = 4096          # max rows per batch tile (~8 MiB double-buffered VMEM)
_MIN_TB = 256           # min tile when splitting (amortizes ~0.35us per-step cost)
_XLA_FALLBACK_B = 512   # below this, plain XLA is as fast or faster than pallas_call


def feedforward_kernel(x_ref, w1_ref, b1_ref, w2_ref, b2_ref, out_ref):
    # x_ref:  (TB, 26) f32 batch tile
    # w1_ref: (H, 26)  f32  layer1.weight, PyTorch (out, in) layout
    # b1_ref: (1, H)   f32
    # w2_ref: (C, H)   f32  layer2.weight, PyTorch (out, in) layout
    # b2_ref: (1, C)   f32
    # out_ref:(TB, C)  f32  unpadded output block
    x = x_ref[...]
    # x @ w1.T without materializing a transpose: contract dim 1 of both sides.
    h = lax.dot_general(
        x, w1_ref[...],
        dimension_numbers=(((1,), (1,)), ((), ())),
        precision=lax.Precision.HIGHEST,        # pinned: match f32 reference numerics
        preferred_element_type=jnp.float32)
    h = jnp.maximum(h + b1_ref[...], 0.0)       # F.relu(layer1(x))
    out = lax.dot_general(
        h, w2_ref[...],
        dimension_numbers=(((1,), (1,)), ((), ())),
        precision=lax.Precision.HIGHEST,
        preferred_element_type=jnp.float32)
    out_ref[...] = out + b2_ref[...]            # layer2(...)


def prepare_params(w1, b1, w2, b2):
    """One-time parameter prep (outside the per-call hot path): dtype + bias shape."""
    H = w1.shape[0]
    C = w2.shape[0]
    w1f = jnp.asarray(w1, jnp.float32)                     # (H, 26)
    b1f = jnp.asarray(b1, jnp.float32).reshape(1, H)       # (1, H)
    w2f = jnp.asarray(w2, jnp.float32)                     # (C, H)
    b2f = jnp.asarray(b2, jnp.float32).reshape(1, C)       # (1, C)
    return w1f, b1f, w2f, b2f


def _round_up(x, m):
    return ((x + m - 1) // m) * m


def _choose_tb(B):
    """Batch tile: big enough to amortize per-step pipeline overhead, small enough
    that a large batch gets >= 4 grid steps (so v7x's 2 TensorCores both get work)."""
    if B <= _MIN_TB:
        return B
    tb = _round_up(pl.cdiv(B, 4), 8)
    return max(_MIN_TB, min(tb, _MAX_TB))


def feedforward_pallas(features, w1f, b1f, w2f, b2f):
    x = features.astype(jnp.float32)            # Variable(features.float())
    B, K = x.shape
    H = w1f.shape[0]
    C = w2f.shape[0]

    TB = _choose_tb(B)
    grid = (pl.cdiv(B, TB),)
    # NOTE: when B % TB != 0 the last block computes on out-of-bounds rows.
    # Rows are fully independent and the out-of-bounds output rows are never
    # written back, so results are correct (just a little wasted work).  Do
    # not add cross-row reductions to this kernel without masking the edge.

    return pl.pallas_call(
        feedforward_kernel,
        out_shape=jax.ShapeDtypeStruct((B, C), jnp.float32),
        grid=grid,
        in_specs=[
            pl.BlockSpec((TB, K), lambda i: (i, 0)),   # x: tiled over batch
            pl.BlockSpec((H, K), lambda i: (0, 0)),    # weights/biases stay
            pl.BlockSpec((1, H), lambda i: (0, 0)),    # VMEM-resident across
            pl.BlockSpec((C, H), lambda i: (0, 0)),    # the whole grid
            pl.BlockSpec((1, C), lambda i: (0, 0)),
        ],
        out_specs=pl.BlockSpec((TB, C), lambda i: (i, 0)),
        compiler_params=pltpu.CompilerParams(
            dimension_semantics=("parallel",),         # v7x: shard batch over 2 TCs
            vmem_limit_bytes=32 * 1024 * 1024),
    )(x, w1f, b1f, w2f, b2f)


def _feedforward_xla(features, w1f, b1f, w2f, b2f):
    """Plain-XLA path for small batches where pallas_call overhead dominates."""
    x = features.astype(jnp.float32)
    h = jnp.maximum(
        lax.dot_general(x, w1f, (((1,), (1,)), ((), ())),
                        precision=lax.Precision.HIGHEST) + b1f, 0.0)
    return lax.dot_general(h, w2f, (((1,), (1,)), ((), ())),
                           precision=lax.Precision.HIGHEST) + b2f


@jax.jit
def feedforward_forward(users, features, text, user_gcn_embed, textembed_w,
                        w1f, b1f, w2f, b2f):
    """Mirrors FeedForward.forward(users, features, text, user_gcn_embed)."""
    # --- dead-code embedding gathers (kept for fidelity; DCE'd under jit) ---
    users_flat = users.reshape(1, -1).astype(jnp.int32).reshape(-1)
    user_embedded = user_gcn_embed[users_flat]                  # user_gcn_embed[users]
    _embedded = user_embedded.reshape(-1, 2 * user_embedded.shape[1])
    _text_embedded = textembed_w[text]                          # nn.Embedding lookup
    # ------------------------------------------------------------------------
    if features.shape[0] < _XLA_FALLBACK_B:
        return _feedforward_xla(features, w1f, b1f, w2f, b2f)
    return feedforward_pallas(features, w1f, b1f, w2f, b2f)


def _reference(features, w1, b1, w2, b2):
    """Pure-JAX reference of the PyTorch forward (f32, highest precision)."""
    x = features.astype(jnp.float32)
    h = jnp.maximum(jnp.dot(x, w1.T, precision=lax.Precision.HIGHEST) + b1, 0.0)
    return jnp.dot(h, w2.T, precision=lax.Precision.HIGHEST) + b2


if __name__ == "__main__":
    # Module hyper-params (small, consistent with the constructor)
    num_users = 10
    hidden_size = 32
    num_classes = 4
    vocab_size = 50
    batch = 8
    in_features = 26   # layer1 = nn.Linear(26, hidden_size)
    seq = 12

    key = jax.random.PRNGKey(0)
    ks = jax.random.split(key, 9)

    # Deterministic parameter init (uniform(-0.2, 0.2), like init_weights)
    w1 = jax.random.uniform(ks[0], (hidden_size, in_features), jnp.float32, -0.2, 0.2)
    b1 = jax.random.uniform(ks[1], (hidden_size,), jnp.float32, -0.2, 0.2)
    w2 = jax.random.uniform(ks[2], (num_classes, hidden_size), jnp.float32, -0.2, 0.2)
    b2 = jax.random.uniform(ks[3], (num_classes,), jnp.float32, -0.2, 0.2)
    textembed_w = jax.random.uniform(ks[4], (vocab_size, hidden_size), jnp.float32, -0.2, 0.2)
    textembed_w = textembed_w.at[0].set(0.0)   # padding_idx=0

    # One-time parameter prep (hoisted out of the per-call path)
    w1f, b1f, w2f, b2f = prepare_params(w1, b1, w2, b2)

    # Example forward inputs
    users = jax.random.randint(ks[5], (2 * batch,), 0, num_users)  # even length -> view(-1, 2H)
    features = jax.random.normal(ks[6], (batch, in_features), jnp.float32)
    text = jax.random.randint(ks[7], (batch, seq), 0, vocab_size)
    user_gcn_embed = jax.random.normal(key, (num_users, hidden_size), jnp.float32)

    # 1) Pallas kernel on the small demo batch (single block).
    out_small = jax.block_until_ready(feedforward_pallas(features, w1f, b1f, w2f, b2f))
    ref_small = _reference(features, w1, b1, w2, b2)
    assert out_small.shape == (batch, num_classes)
    assert jnp.allclose(out_small, ref_small, atol=1e-5, rtol=1e-5)

    # 2) Pallas kernel on a larger batch: multi-step grid + partial edge block.
    big_b = 600
    features_big = jax.random.normal(ks[8], (big_b, in_features), jnp.float32)
    out_big = jax.block_until_ready(feedforward_pallas(features_big, w1f, b1f, w2f, b2f))
    ref_big = _reference(features_big, w1, b1, w2, b2)
    assert out_big.shape == (big_b, num_classes)
    assert jnp.allclose(out_big, ref_big, atol=1e-5, rtol=1e-5)

    # 3) Full jitted forward (dead gathers included); small B takes the XLA
    #    fallback path by design.
    out_fwd = jax.block_until_ready(
        feedforward_forward(users, features, text, user_gcn_embed, textembed_w,
                            w1f, b1f, w2f, b2f))
    assert out_fwd.shape == (batch, num_classes)
    assert jnp.allclose(out_fwd, ref_small, atol=1e-5, rtol=1e-5)

    print("KERNEL_OK")
</pallas_src>

<mosaic_0001>
module attributes {stable_mosaic.version = 11 : i64} {
  func.func @feedforward_kernel(%arg0: i32, %arg1: memref<8x26xf32, #tpu.memory_space<vmem>>, %arg2: memref<32x26xf32, #tpu.memory_space<vmem>>, %arg3: memref<1x32xf32, #tpu.memory_space<vmem>>, %arg4: memref<4x32xf32, #tpu.memory_space<vmem>>, %arg5: memref<1x4xf32, #tpu.memory_space<vmem>>, %arg6: memref<8x4xf32, #tpu.memory_space<vmem>>) attributes {dimension_semantics = [#tpu.dimension_semantics<parallel>], iteration_bounds = array<i64: 1>, scalar_prefetch = 0 : i64, scratch_operands = 0 : i64, tpu.core_type = #tpu.core_type<tc>, window_params = [{transform_indices = @transform_0, window_bounds = array<i64: 8, 26>}, {pipeline_mode = #tpu.pipeline_mode<synchronous>, transform_indices = @transform_1, window_bounds = array<i64: 32, 26>}, {pipeline_mode = #tpu.pipeline_mode<synchronous>, transform_indices = @transform_2, window_bounds = array<i64: 1, 32>}, {pipeline_mode = #tpu.pipeline_mode<synchronous>, transform_indices = @transform_3, window_bounds = array<i64: 4, 32>}, {pipeline_mode = #tpu.pipeline_mode<synchronous>, transform_indices = @transform_4, window_bounds = array<i64: 1, 4>}, {transform_indices = @transform_5, window_bounds = array<i64: 8, 4>}]} {
    %c0 = arith.constant 0 : index
    %c0_0 = arith.constant 0 : index
    %0 = vector.load %arg1[%c0, %c0_0] : memref<8x26xf32, #tpu.memory_space<vmem>>, vector<8x26xf32>
    %c0_1 = arith.constant 0 : index
    %c0_2 = arith.constant 0 : index
    %1 = vector.load %arg2[%c0_1, %c0_2] : memref<32x26xf32, #tpu.memory_space<vmem>>, vector<32x26xf32>
    %cst = arith.constant dense<0.000000e+00> : vector<8x32xf32>
    %2 = tpu.matmul %0, %1, %cst {dimension_numbers = #tpu.dot_dimension_numbers<[1], [1], [0], [0], [0, 0, 1, 0], [], []>, precision = #tpu.contract_precision<fp32>} : vector<8x26xf32>, vector<32x26xf32>, vector<8x32xf32> -> vector<8x32xf32>
    %c0_3 = arith.constant 0 : index
    %c0_4 = arith.constant 0 : index
    %3 = vector.load %arg3[%c0_3, %c0_4] : memref<1x32xf32, #tpu.memory_space<vmem>>, vector<1x32xf32>
    %4 = vector.broadcast %3 : vector<1x32xf32> to vector<8x32xf32>
    %5 = arith.addf %2, %4 : vector<8x32xf32>
    %cst_5 = arith.constant 0.000000e+00 : f32
    %6 = vector.broadcast %cst_5 : f32 to vector<8x32xf32>
    %7 = arith.maximumf %5, %6 : vector<8x32xf32>
    %c0_6 = arith.constant 0 : index
    %c0_7 = arith.constant 0 : index
    %8 = vector.load %arg4[%c0_6, %c0_7] : memref<4x32xf32, #tpu.memory_space<vmem>>, vector<4x32xf32>
    %cst_8 = arith.constant dense<0.000000e+00> : vector<8x4xf32>
    %9 = tpu.matmul %7, %8, %cst_8 {dimension_numbers = #tpu.dot_dimension_numbers<[1], [1], [0], [0], [0, 0, 1, 0], [], []>, precision = #tpu.contract_precision<fp32>} : vector<8x32xf32>, vector<4x32xf32>, vector<8x4xf32> -> vector<8x4xf32>
    %c0_9 = arith.constant 0 : index
    %c0_10 = arith.constant 0 : index
    %10 = vector.load %arg5[%c0_9, %c0_10] : memref<1x4xf32, #tpu.memory_space<vmem>>, vector<1x4xf32>
    %11 = vector.broadcast %10 : vector<1x4xf32> to vector<8x4xf32>
    %12 = arith.addf %9, %11 : vector<8x4xf32>
    %c0_11 = arith.constant 0 : index
    %c0_12 = arith.constant 0 : index
    %13 = vector.load %arg6[%c0_11, %c0_12] : memref<8x4xf32, #tpu.memory_space<vmem>>, vector<8x4xf32>
    tpu.vector_store %arg6[%c0_11, %c0_12], %12 {strides = array<i32>} : memref<8x4xf32, #tpu.memory_space<vmem>>, vector<8x4xf32>,
    return
  }
  func.func @transform_0(%arg0: i32) -> (i32, i32) {
    %c0_i32 = arith.constant 0 : i32
    %c0_i32_0 = arith.constant 0 : i32
    return %arg0, %c0_i32 : i32, i32
  }
  func.func @transform_1(%arg0: i32) -> (i32, i32) {
    %c0_i32 = arith.constant 0 : i32
    %c0_i32_0 = arith.constant 0 : i32
    %c0_i32_1 = arith.constant 0 : i32
    return %c0_i32, %c0_i32_0 : i32, i32
  }
  func.func @transform_2(%arg0: i32) -> (i32, i32) {
    %c0_i32 = arith.constant 0 : i32
    %c0_i32_0 = arith.constant 0 : i32
    %c0_i32_1 = arith.constant 0 : i32
    return %c0_i32, %c0_i32_0 : i32, i32
  }
  func.func @transform_3(%arg0: i32) -> (i32, i32) {
    %c0_i32 = arith.constant 0 : i32
    %c0_i32_0 = arith.constant 0 : i32
    %c0_i32_1 = arith.constant 0 : i32
    return %c0_i32, %c0_i32_0 : i32, i32
  }
  func.func @transform_4(%arg0: i32) -> (i32, i32) {
    %c0_i32 = arith.constant 0 : i32
    %c0_i32_0 = arith.constant 0 : i32
    %c0_i32_1 = arith.constant 0 : i32
    return %c0_i32, %c0_i32_0 : i32, i32
  }
  func.func @transform_5(%arg0: i32) -> (i32, i32) {
    %c0_i32 = arith.constant 0 : i32
    %c0_i32_0 = arith.constant 0 : i32
    return %arg0, %c0_i32 : i32, i32
  }
}

</mosaic_0001>

<bundles_post_ra>
// kernel: tpu_custom_call.1
= control target key start
LH: loop header
LB: loop body
LE: loop exit
PB: predicated region body
PF: predicated region fallthrough
CT: control target
= control target key end

     0   :  { %10 = vsyncpa [#allocation3], 0  ;;  %s1403_s0 = inlined_call_operand.hbm [shape: f32[8,26], index: 0, kind: input, shape index: {}]   ;;  %s1404_s1 = inlined_call_operand.hbm [shape: f32[32,26], index: 1, kind: input, shape index: {}]   ;;  %s1405_s2 = inlined_call_operand.vmem [shape: f32[1,32], index: 2, kind: input, shape index: {}]   ;;  %s1406_s3 = inlined_call_operand.vmem [shape: f32[4,32], index: 3, kind: input, shape index: {}]   ;;  %s1407_s4 = inlined_call_operand.vmem [shape: f32[1,4], index: 4, kind: input, shape index: {}]   ;;  %s1408_s5 = inlined_call_operand.vmem [shape: f32[8,4], index: 5, kind: output, shape index: {}]  }
   0x1   :  { %11 = vsyncpa [#allocation5], 0  ;;  %s1281_s18 = smov [#allocation2]   ;;  %s1282_s20 = smov [#allocation4]  }
   0x2   :  { %s18_s19 = sshll.u32 %s1281_s18, 4  ;;  %s27_s21 = sshll.u32 %s1282_s20, 4  ;;  %s19_s19 = int_to_ptr.vmem [resolvable:$true] %s18_s19  ;;  %s1318_s21 = int_to_ptr.vmem [resolvable:$true] %s27_s21 }
   0x3   :  { %s1233_s24 = scalar_lea.hbm %s1403_s0, 128 }
   0x4   :  { %p1234_p0 = scmp.ne.s32.totalorder %s1403_s0, %s1233_s24  ;;  %p1237_p1 = scmp.lt.u32.totalorder %s1233_s24, %s1403_s0 }
   0x6   :  { %p1239_p2 = pnand %p1237_p1, %p1234_p0 }
   0x8   :  { %1242 = shalt.err (!%p1239_p2)
}
   0x9   :  { %s1243_s29 = scalar_lea.vmem %s19_s19, 128  ;;  %p1248_p4 = scmp.lt.s32.totalorder %s19_s19, %s19_s19 }
   0xa   :  { %p1244_p3 = scmp.ne.s32.totalorder %s19_s19, %s1243_s29  ;;  %p1249_p5 = scmp.lt.s32.totalorder %s1243_s29, %s1243_s29 }
   0xc   :  { %p1250_p6 = por %p1249_p5, %p1248_p4 }
   0xe   :  { %p1251_p7 = pnand %p1250_p6, %p1244_p3 }
  0x10   :  { %1254 = shalt.err (!%p1251_p7)
}
  0x11   :  { %21 = dma.hbm_to_vmem [thread:$0]  %s1403_s0, 128, %s19_s19, [#allocation3]  }
  0x12   :  { %s1255_s9 = scalar_lea.hbm %s1404_s1, 512 }
  0x13   :  { %p1256_p8 = scmp.ne.s32.totalorder %s1404_s1, %s1255_s9  ;;  %p1259_p9 = scmp.lt.u32.totalorder %s1255_s9, %s1404_s1 }
  0x15   :  { %p1261_p10 = pnand %p1259_p9, %p1256_p8 }
  0x17   :  { %1264 = shalt.err (!%p1261_p10)
}
  0x18   :  { %s1265_s14 = scalar_lea.vmem %s1318_s21, 512  ;;  %p1270_p12 = scmp.lt.s32.totalorder %s1318_s21, %s1318_s21 }
  0x19   :  { %p1266_p11 = scmp.ne.s32.totalorder %s1318_s21, %s1265_s14  ;;  %p1271_p13 = scmp.lt.s32.totalorder %s1265_s14, %s1265_s14 }
  0x1b   :  { %p1272_p0 = por %p1271_p13, %p1270_p12 }
  0x1d   :  { %p1273_p1 = pnand %p1272_p0, %p1266_p11 }
  0x1f   :  { %1276 = shalt.err (!%p1273_p1)
}
  0x20   :  { %s1283_s0 = smov 128   ;;  %s1284_s15 = smov 8  }
  0x21   :  { %33 = dma.hbm_to_vmem [thread:$0]  %s1404_s1, 512, %s1318_s21, [#allocation5], %s1283_s0, %s1283_s0, %s1284_s15  }
  0x22   :  { %1277 = dma.done.wait [#allocation3], 128  }
  0x23   :  { %1278 = vsyncadd [#allocation3], 4294967168 }
  0x24   :  { %1279 = dma.done.wait [#allocation5], 512  }
  0x25   :  { %1280 = vsyncadd [#allocation5], 4294966784  ;;  %v1285_v0 = vmov 0.0|0.0   ;;  %vm1286_vm0 = vmmov 0   ;;  %v1287_v1 = vmov 0.0   ;;  %vm58_vm1 = vcmask 211968  }
  0x26   :  { %1181 = vmatprep.subr.bf16.mxu0 %v1285_v0  ;;  %1169 = vmatprep.subr.bf16.mxu1 %v1285_v0  ;;  %v47_v2 = vld [vmem:[#allocation4] sm:$0xff]  ;;  %v48_v3 = vld [vmem:[#allocation4 + $0x8] sm:$0xff]  ;;  %v49_v4 = vld [vmem:[#allocation4 + $0x10] sm:$0xff]  ;;  %vm568_vm2 = vcmask 261120   ;;  %vm1021_vm3 = vcmask 31744  }
  0x27   :  { %1103 = vmatprep.mubr.msk.f32.mxu0 %vm1286_vm0, %v1287_v1  ;;  %1081 = vmatprep.mubr.msk.f32.mxu1 %vm1286_vm0, %v1287_v1  ;;  %v63_v5 = vsel %vm58_vm1, %v47_v2, 0  ;;  %v66_v6 = vsel %vm58_vm1, %v48_v3, 0  ;;  %v50_v7 = vld [vmem:[#allocation4 + $0x18] sm:$0xff]  ;;  %v69_v8 = vsel %vm58_vm1, %v49_v4, 0 }
  0x28   :  { %v46_v9 = vld [vmem:[#allocation2] sm:$0xff]  ;;  %v75_v10 = vand.u32 4294901760, %v63_v5  ;;  %v78_v11 = vand.u32 4294901760, %v66_v6  ;;  %v72_v12 = vsel %vm58_vm1, %v50_v7, 0  ;;  %v81_v13 = vand.u32 4294901760, %v69_v8 }
  0x29   :  { %v60_v14 = vsel %vm58_vm1, %v46_v9, 0  ;;  %v84_v17 = vand.u32 4294901760, %v72_v12  ;;  %v560_v45 = vld [vmem:[%s1406_s3] sm:$0xf] }
  0x2a   :  { %v155_v15 = vsub.f32 %v63_v5, %v75_v10  ;;  %v162_v16 = vsub.f32 %v66_v6, %v78_v11  ;;  %v1170_v18 = vpack.c.bf16 %v78_v11, %v75_v10  ;;  %v143_v19 = vand.u32 4294901760, %v60_v14  ;;  %v1029_v50 = vld [vmem:[%s1405_s2] ss:$0 sm:$0xff] }
  0x2b   :  { %v169_v24 = vsub.f32 %v69_v8, %v81_v13  ;;  %v176_v25 = vsub.f32 %v72_v12, %v84_v17  ;;  %v1173_v27 = vpack.c.bf16 %v84_v17, %v81_v13  ;;  %v573_v46 = vsel %vm568_vm2, %v560_v45, 0  ;;  %v1030_v3 = vld [vmem:[%s1407_s4] ss:$0 sm:$0xff] }
  0x2c   :  { %v156_v20 = vand.u32 4294901760, %v155_v15  ;;  %v163_v21 = vand.u32 4294901760, %v162_v16  ;;  %v1182_v22 = vpack.c.bf16 %v162_v16, %v155_v15  ;;  %1171 = vmatpush3.bf16.xpose.msra.mxu1 %v1170_v18  ;;  %v144_v23 = vsub.f32 %v60_v14, %v143_v19 }
  0x2d   :  { %1172 = vmatprep.subr.bf16.mxu1 %v1285_v0  ;;  %v1185_v30 = vpack.c.bf16 %v176_v25, %v169_v24  ;;  %v170_v34 = vand.u32 4294901760, %v169_v24  ;;  %v177_v35 = vand.u32 4294901760, %v176_v25  ;;  %v576_v47 = vand.u32 4294901760, %v573_v46 }
  0x2e   :  { %1183 = vmatpush3.bf16.xpose.msra.mxu0 %v1182_v22  ;;  %v145_v26 = vand.u32 4294901760, %v144_v23  ;;  %v157_v28 = vsub.f32 %v155_v15, %v156_v20  ;;  %v164_v29 = vsub.f32 %v162_v16, %v163_v21  ;;  %v1194_v43 = vpack.c.bf16 %v163_v21, %v156_v20 }
  0x2f   :  { %1184 = vmatprep.subr.bf16.mxu0 %v1285_v0  ;;  %v171_v38 = vsub.f32 %v169_v24, %v170_v34  ;;  %v178_v39 = vsub.f32 %v176_v25, %v177_v35  ;;  %v1197_v44 = vpack.c.bf16 %v177_v35, %v170_v34  ;;  %v653_v54 = vsub.f32 %v573_v46, %v576_v47 }
  0x30   :  { %v146_v31 = vsub.f32 %v144_v23, %v145_v26  ;;  %v158_v32 = vand.u32 4294901760, %v157_v28  ;;  %v165_v33 = vand.u32 4294901760, %v164_v29 }
  0x31   :  { %v172_v40 = vand.u32 4294901760, %v171_v38  ;;  %v179_v41 = vand.u32 4294901760, %v178_v39  ;;  %v654_v58 = vand.u32 4294901760, %v653_v54 }
  0x32   :  { %v147_v36 = vand.u32 4294901760, %v146_v31  ;;  %v1176_v37 = vpack.c.bf16 %v165_v33, %v158_v32 }
  0x33   :  { %v1179_v42 = vpack.c.bf16 %v179_v41, %v172_v40  ;;  %v655_v61 = vsub.f32 %v653_v54, %v654_v58 }
  0x34   :  { %1174 = vmatpush3.bf16.xpose.msra.mxu1 %v1173_v27 }
  0x35   :  { %1175 = vmatprep.subr.bf16.mxu1 %v1285_v0 }
  0x36   :  { %1186 = vmatpush3.bf16.xpose.msra.mxu0 %v1185_v30 }
  0x37   :  { %1187 = vmatprep.subr.bf16.mxu0 %v1285_v0 }
  0x3b   :  { %1082 = vmatmul.mubr.f32.vlgmr.msra.gmra.mrb[0].mxu1 %v147_v36 }
  0x3c   :  { %1177 = vmatpush3.bf16.xpose.msra.mxu1 %v1176_v37  ;;  %1092 = vmatprep.mubr.msk.f32.mxu1 %vm1286_vm0, %v1287_v1 }
  0x3d   :  { %1104 = vmatmul.mubr.f32.vlgmr.msra.gmra.mrb[0].mxu0 %v144_v23  ;;  %1178 = vmatprep.subr.bf16.mxu1 %v1285_v0 }
  0x3e   :  { %1189 = vmatpush3.bf16.xpose.msra.mxu0 %v1170_v18  ;;  %1114 = vmatprep.mubr.msk.f32.mxu0 %vm1286_vm0, %v1287_v1 }
  0x3f   :  { %1190 = vmatprep.subr.bf16.mxu0 %v1285_v0 }
  0x44   :  { %1180 = vmatpush3.bf16.xpose.msra.mxu1 %v1179_v42 }
  0x45   :  { %1139 = vmatprep.subr.mxu1 %v1287_v1 }
  0x46   :  { %1192 = vmatpush3.bf16.xpose.msra.mxu0 %v1173_v27 }
  0x47   :  { %1193 = vmatprep.subr.bf16.mxu0 %v1285_v0 }
  0x4b   :  { %1093 = vmatmul.mubr.f32.vlgmr.msra.gmra.mrb[0].mxu1 %v143_v19 }
  0x4c   :  { %1141 = vmatprep.mubr.msk.f32.mxu1 %vm1286_vm0, %v1287_v1  ;;  %1140 = vmatpush3.xpose.msra.mxu1 %v576_v47 }
  0x4d   :  { %1115 = vmatmul.mubr.f32.vlgmr.msra.gmra.mrb[0].mxu0 %v145_v26  ;;  %1144 = vmatprep.subr.mxu1 %v1287_v1 }
  0x4e   :  { %1195 = vmatpush3.bf16.xpose.msra.mxu0 %v1194_v43  ;;  %1125 = vmatprep.mubr.msk.f32.mxu0 %vm1286_vm0, %v1287_v1 }
  0x4f   :  { %1196 = vmatprep.subr.bf16.mxu0 %v1285_v0 }
  0x56   :  { %1198 = vmatpush3.bf16.xpose.msra.mxu0 %v1197_v44 }
  0x57   :  { %1199 = vmatprep.subr.bf16.mxu0 %v1285_v0 }
  0x5d   :  { %1126 = vmatmul.mubr.f32.vlgmr.msra.gmra.mrb[0].mxu0 %v143_v19 }
  0x5e   :  { %1201 = vmatpush3.bf16.xpose.msra.mxu0 %v1170_v18  ;;  %1136 = vmatprep.mubr.msk.f32.mxu0 %vm1286_vm0, %v1287_v1 }
  0x5f   :  { %1202 = vmatprep.subr.bf16.mxu0 %v1285_v0  ;;  %v656_v0 = vand.u32 4294901760, %v655_v61 }
  0x66   :  { %1204 = vmatpush3.bf16.xpose.msra.mxu0 %v1173_v27 }
  0x6d   :  { %1137 = vmatmul.mubr.f32.vlgmr.msra.gmra.mrb[0].mxu0 %v143_v19 }
 0x11e   :  { %v240_v48 = vpop.f32.mrb[0].mxu1 }
 0x11f   :  { %v1094_v49 = vpop.f32.mrb[1].mxu1  ;;  %v1205_v51 = vadd.f32 %v1029_v50, %v240_v48 }
 0x140   :  { %v555_v52 = vpop.f32.mrb[0].mxu0 }
 0x141   :  { %v1206_v53 = vadd.f32 %v1205_v51, %v555_v52  ;;  %v1138_v55 = vpop.f32.mrb[1].mxu0 }
 0x143   :  { %v559_v56 = vmax.f32 %v1206_v53, 0.0 }
 0x145   :  { %v570_v57 = vsel %vm568_vm2, %v559_v56, 0 }
 0x146   :  { %v641_v59 = vand.u32 4294901760, %v570_v57 }
 0x148   :  { %v642_v60 = vsub.f32 %v570_v57, %v641_v59 }
 0x14a   :  { %v643_v62 = vand.u32 4294901760, %v642_v60 }
 0x14c   :  { %v644_v63 = vsub.f32 %v642_v60, %v643_v62 }
 0x14e   :  { %v645_v2 = vand.u32 4294901760, %v644_v63 }
 0x150   :  { %1142 = vmatmul.mubr.f32.vlgmr.msra.gmra.mrb[2].mxu1 %v645_v2 }
 0x151   :  { %1145 = vmatpush3.xpose.msra.mxu1 %v656_v0  ;;  %1146 = vmatprep.mubr.msk.f32.mxu1 %vm1286_vm0, %v1287_v1 }
 0x152   :  { %1149 = vmatprep.subr.mxu1 %v1287_v1 }
 0x158   :  { %1147 = vmatmul.mubr.f32.vlgmr.msra.gmra.mrb[2].mxu1 %v641_v59 }
 0x159   :  { %1150 = vmatpush3.xpose.msra.mxu1 %v653_v54  ;;  %1151 = vmatprep.mubr.msk.f32.mxu1 %vm1286_vm0, %v1287_v1 }
 0x15a   :  { %1154 = vmatprep.subr.mxu1 %v1287_v1 }
 0x160   :  { %1152 = vmatmul.mubr.f32.vlgmr.msra.gmra.mrb[2].mxu1 %v642_v60 }
 0x161   :  { %1155 = vmatpush3.xpose.msra.mxu1 %v576_v47  ;;  %1156 = vmatprep.mubr.msk.f32.mxu1 %vm1286_vm0, %v1287_v1 }
 0x162   :  { %1159 = vmatprep.subr.mxu1 %v1287_v1 }
 0x168   :  { %1157 = vmatmul.mubr.f32.vlgmr.msra.gmra.mrb[2].mxu1 %v643_v62 }
 0x169   :  { %1160 = vmatpush3.xpose.msra.mxu1 %v654_v58  ;;  %1161 = vmatprep.mubr.msk.f32.mxu1 %vm1286_vm0, %v1287_v1 }
 0x16a   :  { %1164 = vmatprep.subr.mxu1 %v1287_v1 }
 0x170   :  { %1162 = vmatmul.mubr.f32.vlgmr.msra.gmra.mrb[2].mxu1 %v641_v59 }
 0x171   :  { %1165 = vmatpush3.xpose.msra.mxu1 %v576_v47  ;;  %1166 = vmatprep.mubr.msk.f32.mxu1 %vm1286_vm0, %v1287_v1 }
 0x178   :  { %1167 = vmatmul.mubr.f32.vlgmr.msra.gmra.mrb[2].mxu1 %v641_v59 }
 0x24b   :  { %v1017_v4 = vpop.f32.mrb[2].mxu1 }
 0x24c   :  { %v1207_v5 = vadd.f32 %v1030_v3, %v1017_v4  ;;  %v1168_v6 = vpop.f32.mrb[3].mxu1 }
 0x24e   :  { %1022 = vst.msk [vmem:[%s1408_s5] sm:$0xff] %vm1021_vm3, %v1207_v5 }
 0x24f   :  { %1027 = vsyncpa [#allocation3], 1 }
 0x250   :  { %1028 = vsyncpa [#allocation5], 1 }

</bundles_post_ra>
